<compile_context>
chip_gen: v5e
topology: v5e:2x2
jax: 0.10.0
libtpu: 0.0.40
codegen_flags: <defaults>
</compile_context>

<pallas_src>
from functools import partial

import jax
import jax.numpy as jnp
from jax.experimental import pallas as pl
from jax.experimental.pallas import tpu as pltpu


def _round_up(x, m):
    return ((x + m - 1) // m) * m


# ---------------------------------------------------------------------------
# Pallas kernel: lane-dense patch-embed matmul + bias + per-tile NaN flag
# ---------------------------------------------------------------------------
def _patch_embed_kernel(x_ref, w_ref, b_ref, out_ref, flag_ref):
    # x_ref   : (1, K, TM)     bf16   one image's transposed patch tile
    # w_ref   : (C, K)         bf16   shared projection (already W^T)
    # b_ref   : (C, 1)         f32    shared bias (per-sublane constant)
    # out_ref : (1, C, TM)     f32    channel-major (NCHW-ready), lane-dense
    # flag_ref: (1, 1, 8, 128) int32  per-tile "any NaN" flag
    acc = jnp.dot(w_ref[...], x_ref[0], preferred_element_type=jnp.float32)
    acc = acc + b_ref[...]                       # (C,1) + (C,TM): lane splat
    out_ref[0] = acc

    # Replicates torch.any(torch.isnan(img_embed)) for this tile; the
    # reductions ride the XLU slot and hide under the DMA.
    isn = jnp.isnan(acc).astype(jnp.int32)
    f = jnp.max(jnp.max(isn, axis=1, keepdims=True), axis=0, keepdims=True)
    flag_ref[0, 0] = jnp.broadcast_to(f, (8, 128))


# ---------------------------------------------------------------------------
# Jitted forward compute path: im2col (K,M) -> Pallas matmul -> NCHW embed
# ---------------------------------------------------------------------------
@partial(jax.jit, static_argnames=("patch",))
def hpa_image_embed(image, w_t, bias_col, *, patch):
    B, H, W, C = image.shape
    p = patch
    assert C == 3 and H % p == 0 and W % p == 0
    gh, gw = H // p, W // p
    ppi = gh * gw                      # patches per image
    K = p * p * C
    c_embed = w_t.shape[0]

    # im2col directly in transposed (K, M) orientation, bf16 for the
    # HBM-resident operand.  Row order k = kh*(p*C) + kw*C + c; the equivalent
    # PyTorch conv weight (C_out, C_in, kh, kw) satisfies
    #   W_conv[o, c, kh, kw] == w_t[o, kh*p*C + kw*C + c].
    # TODO(synk): for very large images, fuse this rearrangement into the
    # kernel's input DMA (allow_input_fusion / in-kernel im2col) to avoid the
    # HBM-materialized intermediate entirely.
    x = image.astype(jnp.bfloat16).reshape(B, gh, p, gw, p, C)
    x = jnp.transpose(x, (0, 2, 4, 5, 1, 3))       # (B, p, p, C, gh, gw)
    x = x.reshape(B, K, ppi)

    # Fixed-size patch tiles: multiple of 128 (lane-dense), capped at 2048.
    # Per step: in 48*2048*2B ~ 192 KiB + out 32*2048*4B ~ 256 KiB, x2 buffers
    # < 1 MiB -> fits v5e (16 MiB scoped), v6e (32 MiB) and v7x (64 MiB phys).
    tile_m = min(2048, _round_up(ppi, 128))
    padded = _round_up(ppi, tile_m)
    if padded != ppi:
        x = jnp.pad(x, ((0, 0), (0, 0), (0, padded - ppi)))
    n_tiles = padded // tile_m

    embed, flags = pl.pallas_call(
        _patch_embed_kernel,
        grid_spec=pltpu.PrefetchScalarGridSpec(
            num_scalar_prefetch=0,
            grid=(B, n_tiles),
            in_specs=[
                pl.BlockSpec((1, K, tile_m), lambda b, mt: (b, 0, mt)),
                pl.BlockSpec((c_embed, K), lambda b, mt: (0, 0)),
                pl.BlockSpec((c_embed, 1), lambda b, mt: (0, 0)),
            ],
            out_specs=[
                pl.BlockSpec((1, c_embed, tile_m), lambda b, mt: (b, 0, mt)),
                pl.BlockSpec((1, 1, 8, 128), lambda b, mt: (b, mt, 0, 0)),
            ],
        ),
        out_shape=(
            jax.ShapeDtypeStruct((B, c_embed, padded), jnp.float32),
            jax.ShapeDtypeStruct((B, n_tiles, 8, 128), jnp.int32),
        ),
        compiler_params=pltpu.CompilerParams(
            # Every output block is written exactly once -> both axes can be
            # megacore-sharded on v7x.
            dimension_semantics=("parallel", "parallel"),
            vmem_limit_bytes=32 * 1024 * 1024,
        ),
    )(x, w_t.astype(jnp.bfloat16), bias_col)

    # Channel-major output is already NCHW: slice off the lane padding and
    # split the patch axis into (gh, gw).  No transpose needed.
    img_embed = embed[:, :, :ppi].reshape(B, c_embed, gh, gw)
    nan_flag = jnp.max(flags) > 0
    return img_embed, nan_flag


# ---------------------------------------------------------------------------
# HPAHybridEmbedder forward (thin Python wrapper)
# ---------------------------------------------------------------------------
class HPAHybridEmbedderPallas:
    def __init__(self, patch=4, c_embed=32, include_location=False, seed=0):
        self.patch = patch
        self.c_embed = c_embed
        self.include_location = include_location
        k = jax.random.PRNGKey(seed)
        kw, kb = jax.random.split(k)
        kdim = patch * patch * 3
        # Deterministic synthetic "image_embedding_model" parameters, stored
        # pre-transposed (C_out, K) for the lane-dense kernel layout.
        self.weight_t = (jax.random.normal(kw, (c_embed, kdim), jnp.float32)
                         / jnp.sqrt(jnp.float32(kdim)))
        self.bias_col = 0.01 * jax.random.normal(kb, (c_embed, 1), jnp.float32)
        self.last_nan_flag = None

    def forward(self, batch, key=None, check_nan=True):
        image = batch['ref-image']                 # (B, H, W, 3) NHWC
        assert image.shape[3] == 3
        # (PyTorch rearranges b h w c -> b c h w; here the NHWC->"NCHW" layout
        #  is folded into the kernel's channel-major output — no transpose op.)
        img_embed, nan_flag = hpa_image_embed(
            image, self.weight_t, self.bias_col, patch=self.patch)
        self.last_nan_flag = nan_flag              # device scalar, no sync
        if check_nan:
            # Single scalar fetch at a coarse boundary (pass check_nan=False
            # to defer entirely and inspect self.last_nan_flag later).
            if bool(jax.device_get(nan_flag)):
                raise Exception('NAN values encountered in the image embedding')

        cellline = batch['cell-line']              # passed through as-is
        cross_embed = [cellline]
        if self.include_location:
            cross_embed.append(batch['location_classes'])
        return {'c_concat': [img_embed], 'c_crossattn': cross_embed}

    # TODO(synk): decode() needs the (unavailable) decoder of
    # image_embedding_model + torchvision.make_grid; not reproduced here.


if __name__ == "__main__":
    key = jax.random.PRNGKey(0)
    k_img, k_cell = jax.random.split(key)

    B, H, W = 2, 16, 16
    P = 4
    C_EMBED = 32
    N_CELLLINES = 35  # HPA cell-line one-hot dimensionality (pass-through)

    ref_image = jax.random.uniform(k_img, (B, H, W, 3), jnp.float32)
    cell_idx = jax.random.randint(k_cell, (B,), 0, N_CELLLINES)
    cell_line = jax.nn.one_hot(cell_idx, N_CELLLINES, dtype=jnp.float32)

    batch = {'ref-image': ref_image, 'cell-line': cell_line}

    embedder = HPAHybridEmbedderPallas(patch=P, c_embed=C_EMBED,
                                       include_location=False, seed=0)
    out = embedder.forward(batch)

    img_embed = jax.block_until_ready(out['c_concat'][0])
    cross = jax.block_until_ready(out['c_crossattn'][0])

    assert img_embed.shape == (B, C_EMBED, H // P, W // P), img_embed.shape
    assert cross.shape == (B, N_CELLLINES), cross.shape
    assert not bool(jnp.any(jnp.isnan(img_embed)))

    # Pure-JAX reference (same bf16 operands, f32 accumulation).
    gh, gw = H // P, W // P
    xr = ref_image.astype(jnp.bfloat16).reshape(B, gh, P, gw, P, 3)
    xr = jnp.transpose(xr, (0, 2, 4, 5, 1, 3)).reshape(B, P * P * 3, gh * gw)
    ref = jnp.einsum('ck,bkm->bcm', embedder.weight_t.astype(jnp.bfloat16), xr,
                     preferred_element_type=jnp.float32)
    ref = (ref + embedder.bias_col[None]).reshape(B, C_EMBED, gh, gw)
    assert jnp.allclose(img_embed, ref, rtol=1e-2, atol=1e-2)

    print("KERNEL_OK")
</pallas_src>

<mosaic_0001>
module attributes {stable_mosaic.version = 11 : i64} {
  func.func @_patch_embed_kernel(%arg0: i32, %arg1: i32, %arg2: memref<1x48x128xbf16, #tpu.memory_space<vmem>>, %arg3: memref<32x48xbf16, #tpu.memory_space<vmem>>, %arg4: memref<32x1xf32, #tpu.memory_space<vmem>>, %arg5: memref<1x32x128xf32, #tpu.memory_space<vmem>>, %arg6: memref<1x1x8x128xi32, #tpu.memory_space<vmem>>) attributes {dimension_semantics = [#tpu.dimension_semantics<parallel>, #tpu.dimension_semantics<parallel>], iteration_bounds = array<i64: 2, 1>, scalar_prefetch = 0 : i64, scratch_operands = 0 : i64, tpu.core_type = #tpu.core_type<tc>, window_params = [{transform_indices = @transform_0, window_bounds = array<i64: 1, 48, 128>}, {pipeline_mode = #tpu.pipeline_mode<synchronous>, transform_indices = @transform_1, window_bounds = array<i64: 32, 48>}, {pipeline_mode = #tpu.pipeline_mode<synchronous>, transform_indices = @transform_2, window_bounds = array<i64: 32, 1>}, {transform_indices = @transform_3, window_bounds = array<i64: 1, 32, 128>}, {transform_indices = @transform_4, window_bounds = array<i64: 1, 1, 8, 128>}]} {
    %c0 = arith.constant 0 : index
    %c0_0 = arith.constant 0 : index
    %0 = vector.load %arg3[%c0, %c0_0] : memref<32x48xbf16, #tpu.memory_space<vmem>>, vector<32x48xbf16>
    %c0_1 = arith.constant 0 : index
    %c0_2 = arith.constant 0 : index
    %c0_3 = arith.constant 0 : index
    %1 = vector.load %arg2[%c0_1, %c0_2, %c0_3] : memref<1x48x128xbf16, #tpu.memory_space<vmem>>, vector<1x48x128xbf16>
    %2 = vector.shape_cast %1 : vector<1x48x128xbf16> to vector<48x128xbf16>
    %cst = arith.constant dense<0.000000e+00> : vector<32x128xf32>
    %3 = tpu.matmul %0, %2, %cst {dimension_numbers = #tpu.dot_dimension_numbers<[1], [0], [0], [1], [0, 0, 1, 1], [], []>} : vector<32x48xbf16>, vector<48x128xbf16>, vector<32x128xf32> -> vector<32x128xf32>
    %c0_4 = arith.constant 0 : index
    %c0_5 = arith.constant 0 : index
    %4 = vector.load %arg4[%c0_4, %c0_5] : memref<32x1xf32, #tpu.memory_space<vmem>>, vector<32x1xf32>
    %5 = vector.broadcast %4 : vector<32x1xf32> to vector<32x128xf32>
    %6 = arith.addf %3, %5 : vector<32x128xf32>
    %c0_6 = arith.constant 0 : index
    %c0_7 = arith.constant 0 : index
    %c0_8 = arith.constant 0 : index
    %7 = vector.load %arg5[%c0_6, %c0_7, %c0_8] : memref<1x32x128xf32, #tpu.memory_space<vmem>>, vector<1x32x128xf32>
    %8 = vector.shape_cast %7 : vector<1x32x128xf32> to vector<32x128xf32>
    %9 = vector.shape_cast %6 : vector<32x128xf32> to vector<1x32x128xf32>
    tpu.vector_store %arg5[%c0_6, %c0_7, %c0_8], %9 {strides = array<i32>} : memref<1x32x128xf32, #tpu.memory_space<vmem>>, vector<1x32x128xf32>,
    %10 = arith.cmpf one, %6, %6 : vector<32x128xf32>
    %11 = arith.extui %10 : vector<32x128xi1> to vector<32x128xi32>
    %cst_9 = arith.constant dense<-2147483648> : vector<32xi32>
    %12 = vector.multi_reduction <maxsi>, %11, %cst_9 [1] : vector<32x128xi32> to vector<32xi32>
    %13 = vector.shape_cast %12 : vector<32xi32> to vector<32x1xi32>
    %cst_10 = arith.constant dense<-2147483648> : vector<1xi32>
    %14 = vector.multi_reduction <maxsi>, %13, %cst_10 [0] : vector<32x1xi32> to vector<1xi32>
    %15 = vector.shape_cast %14 : vector<1xi32> to vector<1x1xi32>
    %16 = vector.shape_cast %15 : vector<1x1xi32> to vector<1x1xi32>
    %17 = vector.broadcast %16 : vector<1x1xi32> to vector<8x128xi32>
    %c0_11 = arith.constant 0 : index
    %c0_12 = arith.constant 0 : index
    %c0_13 = arith.constant 0 : index
    %c0_14 = arith.constant 0 : index
    %18 = vector.load %arg6[%c0_11, %c0_12, %c0_13, %c0_14] : memref<1x1x8x128xi32, #tpu.memory_space<vmem>>, vector<1x1x8x128xi32>
    %19 = vector.shape_cast %18 : vector<1x1x8x128xi32> to vector<8x128xi32>
    %20 = vector.shape_cast %17 : vector<8x128xi32> to vector<1x1x8x128xi32>
    tpu.vector_store %arg6[%c0_11, %c0_12, %c0_13, %c0_14], %20 {strides = array<i32>} : memref<1x1x8x128xi32, #tpu.memory_space<vmem>>, vector<1x1x8x128xi32>,
    return
  }
  func.func @transform_0(%arg0: i32, %arg1: i32) -> (i32, i32, i32) {
    %c0_i32 = arith.constant 0 : i32
    %c0_i32_0 = arith.constant 0 : i32
    return %arg0, %c0_i32, %arg1 : i32, i32, i32
  }
  func.func @transform_1(%arg0: i32, %arg1: i32) -> (i32, i32) {
    %c0_i32 = arith.constant 0 : i32
    %c0_i32_0 = arith.constant 0 : i32
    %c0_i32_1 = arith.constant 0 : i32
    return %c0_i32, %c0_i32_0 : i32, i32
  }
  func.func @transform_2(%arg0: i32, %arg1: i32) -> (i32, i32) {
    %c0_i32 = arith.constant 0 : i32
    %c0_i32_0 = arith.constant 0 : i32
    %c0_i32_1 = arith.constant 0 : i32
    return %c0_i32, %c0_i32_0 : i32, i32
  }
  func.func @transform_3(%arg0: i32, %arg1: i32) -> (i32, i32, i32) {
    %c0_i32 = arith.constant 0 : i32
    %c0_i32_0 = arith.constant 0 : i32
    return %arg0, %c0_i32, %arg1 : i32, i32, i32
  }
  func.func @transform_4(%arg0: i32, %arg1: i32) -> (i32, i32, i32, i32) {
    %c0_i32 = arith.constant 0 : i32
    %c0_i32_0 = arith.constant 0 : i32
    %c0_i32_1 = arith.constant 0 : i32
    return %arg0, %arg1, %c0_i32, %c0_i32_0 : i32, i32, i32, i32
  }
}

</mosaic_0001>

<bundles_post_ra>
// kernel: hpa_image_embed.1
= control target key start
LH: loop header
LB: loop body
LE: loop exit
PB: predicated region body
PF: predicated region fallthrough
CT: control target
= control target key end

     0   :  { %s665_s15 = smov 0   ;;  %s667_s16 = smov 0   ;;  %s724_s0 = inlined_call_operand.vmem [shape: bf16[2,48,128], index: 0, kind: input, shape index: {}]   ;;  %s725_s1 = inlined_call_operand.vmem [shape: bf16[32,48], index: 1, kind: input, shape index: {}]   ;;  %s726_s2 = inlined_call_operand.vmem [shape: f32[32,1], index: 2, kind: input, shape index: {}]   ;;  %s727_s3 = inlined_call_operand.vmem [shape: f32[2,32,128], index: 3, kind: output, shape index: {0}]   ;;  %s728_s4 = inlined_call_operand.vmem [shape: s32[2,1,8,128], index: 4, kind: output, shape index: {1}]  }
   0x1   :  { %s669_s17 = smov 0  }
   0x2 LB: > { %s27_s18 = sadd.s32 1, %s633_s16  ;;  %p549_p0 = scmp.ge.s32.totalorder %s637_s17, 1  ;;  %s637_s17 = sphi %s669_s17, %s15_s17   ;;  %s633_s16 = sphi %s667_s16, %s730_s16   ;;  %s629_s15 = sphi %s665_s15, %s729_s15  }
   0x3   : > { %p29_p1 = scmp.ge.s32.totalorder %s27_s18, 2  ;;  %p186_p2 = scmp.lt.s32.totalorder %s637_s17, 3 }
   0x5   : > { %s732_s18 = smov (%p29_p1, %s27_s18), 0  ;;  %p187_p3 = pnand %p549_p0, %p186_p2 }
   0x6   : > { %p225_p4 = scmp.lt.s32.totalorder (!%p187_p3), %s629_s15, 1 }
   0x7   : > { %190 = sbr.rel (%p187_p3) target bundleno = 441 (0x1b9), region = 32 }
   0xc   : > { %v259_v0 = vld [vmem:[%s726_s2] sm:$0xff]  ;;  %v639_v1 = vmov 0   ;;  %v261_v2 = vld [vmem:[%s726_s2 + $0x10] sm:$0xff]  ;;  %s734_s15 = smov (!%p225_p4, %s629_s15), 1  ;;  %v260_v4 = vld [vmem:[%s726_s2 + $0x8] sm:$0xff]  ;;  %vm311_vm0 = vcmask 392192  }
   0xd   : > { %613 = vset.pattern.permute.xlu0 %v639_v1  ;;  %614 = vset.pattern.permute.xlu1 %v639_v1  ;;  %s587_s23 = smul.u32 24, %s734_s15  ;;  %v262_v5 = vld [vmem:[%s726_s2 + $0x18] sm:$0xff]  ;;  %v579_v8 = vld [vmem:[%s725_s1] sm:$0xff]  ;;  %v580_v9 = vld [vmem:[%s725_s1 + $0x8] sm:$0xff]  ;;  %s578_s9 = sshll.u32 %s734_s15, 5 }
   0xe   : > { %265 = vperm.xlu0 %613, %v259_v0   ;;  %275 = vperm.xlu1 %614, %v261_v2   ;;  %s240_s12 = scalar_lea.vmem %s727_s3, %s578_s9  ;;  %s553_s13 = sshll.u32 %s734_s15, 3 }
   0xf   : > { %s232_s26 = scalar_lea.vmem %s724_s0, %s587_s23  ;;  %s247_s20 = scalar_lea.vmem %s728_s4, %s553_s13 }
  0x10   : > { %v583_v3 = vld [vmem:[%s232_s26 + $0x10] sm:$0xff]  ;;  %v582_v6 = vld [vmem:[%s232_s26 + $0x8] sm:$0xff]  ;;  %v581_v7 = vld [vmem:[%s232_s26] sm:$0xff] }
  0x11   : > { %323 = vmatpush.bf16.msra.mxu0 %v583_v3  ;;  %584 = vmatpush.bf16.msra.mxu1 %v583_v3 }
  0x15   : > { %324 = vmatpush.bf16.msra.mxu0 %v582_v6  ;;  %585 = vmatpush.bf16.msra.mxu1 %v582_v6 }
  0x16   : > { %270 = vperm.xlu0 %613, %v260_v4   ;;  %280 = vperm.xlu1 %614, %v262_v5  }
  0x19   : > { %325 = vmatpush.bf16.msra.mxu0 %v581_v7  ;;  %586 = vmatpush.bf16.msra.mxu1 %v581_v7 }
  0x1c   : > { %574 = vmatmul.msk.bf16.vlgmr.msra.gmra.mxu0 %vm311_vm0, %v579_v8  ;;  %575 = vmatmul.msk.bf16.vlgmr.msra.gmra.mxu1 %vm311_vm0, %v580_v9 }
  0x80   : > { %v276_v10 = vpop.permute.xlu1 %275  ;;  %v266_v11 = vpop.permute.xlu0 %265 }
  0x88   : > { %v281_v20 = vpop.permute.xlu1 %280  ;;  %v271_v21 = vpop.permute.xlu0 %270 }
  0x99   : > { %v327_v12 = vpop.f32.mrf.mxu0  ;;  %v332_v13 = vpop.f32.mrf.mxu1 }
  0x9a   : > { %v328_v14 = vadd.f32 %v327_v12, %v266_v11  ;;  %v333_v15 = vadd.f32 %v332_v13, %v276_v10 }
  0x9c   : > { %337 = vst [vmem:[%s240_s12] sm:$0xff] %v328_v14  ;;  %vm341_vm1 = vcmp.ne.f32.partialorder %v328_v14, %v328_v14  ;;  %vm343_vm2 = vcmp.ne.f32.partialorder %v333_v15, %v333_v15 }
  0x9d   : > { %339 = vst [vmem:[%s240_s12 + $0x10] sm:$0xff] %v333_v15  ;;  %v347_v16 = vsel %vm343_vm2, 1, %v639_v1  ;;  %v345_v17 = vsel %vm341_vm1, 1, %v639_v1 }
  0x9e   : > { %v378_v18 = vshra.s32 %v347_v16, 16  ;;  %v350_v19 = vshra.s32 %v345_v17, 16  ;;  %v349_v34 = vand.u32 65535, %v345_v17  ;;  %v377_v39 = vand.u32 65535, %v347_v16 }
  0xa0   : > { %v380_v22 = vcvt.s32.f32 %v378_v18  ;;  %v352_v23 = vcvt.s32.f32 %v350_v19  ;;  %v351_v36 = vcvt.s32.f32 %v349_v34  ;;  %v379_v40 = vcvt.s32.f32 %v377_v39 }
  0xa1   : > { %v329_v24 = vpop.f32.mrf.mxu0  ;;  %v334_v25 = vpop.f32.mrf.mxu1 }
  0xa2   : > { %v330_v26 = vadd.f32 %v329_v24, %v271_v21  ;;  %v335_v27 = vadd.f32 %v334_v25, %v281_v20  ;;  %381 = vmax.xlane.f32.xlu0 %v380_v22  ;;  %353 = vmax.xlane.f32.xlu2 %v352_v23 }
  0xa4   : > { %338 = vst [vmem:[%s240_s12 + $0x8] sm:$0xff] %v330_v26  ;;  %vm342_vm3 = vcmp.ne.f32.partialorder %v330_v26, %v330_v26  ;;  %vm344_vm4 = vcmp.ne.f32.partialorder %v335_v27, %v335_v27 }
  0xa5   : > { %340 = vst [vmem:[%s240_s12 + $0x18] sm:$0xff] %v335_v27  ;;  %v348_v28 = vsel %vm344_vm4, 1, %v639_v1  ;;  %v346_v29 = vsel %vm342_vm3, 1, %v639_v1 }
  0xa6   : > { %v392_v30 = vshra.s32 %v348_v28, 16  ;;  %v364_v31 = vshra.s32 %v346_v29, 16  ;;  %v363_v43 = vand.u32 65535, %v346_v29  ;;  %v391_v47 = vand.u32 65535, %v348_v28 }
  0xa8   : > { %v394_v32 = vcvt.s32.f32 %v392_v30  ;;  %v366_v33 = vcvt.s32.f32 %v364_v31  ;;  %v365_v44 = vcvt.s32.f32 %v363_v43  ;;  %v393_v48 = vcvt.s32.f32 %v391_v47 }
  0xaa   : > { %395 = vmax.xlane.f32.xlu1 %v394_v32  ;;  %367 = vmax.xlane.f32.xlu2 %v366_v33 }
 0x115   : > { %v354_v35 = vpop.xlane.xlu2 %353  ;;  %v382_v38 = vpop.xlane.xlu0 %381 }
 0x116   : > { %vm355_vm5 = vcmp.eq.f32.partialorder %v352_v23, %v354_v35  ;;  %vm383_vm6 = vcmp.eq.f32.partialorder %v380_v22, %v382_v38  ;;  %v360_v54 = vcvt.f32.s32 %v354_v35  ;;  %v388_v56 = vcvt.f32.s32 %v382_v38 }
 0x117   : > { %v356_v37 = vsel %vm355_vm5, %v351_v36, -inf  ;;  %v384_v41 = vsel %vm383_vm6, %v379_v40, -inf }
 0x118   : > { %357 = vmax.xlane.f32.xlu2 %v356_v37  ;;  %v361_v60 = vshll.u32 %v360_v54, 16  ;;  %v389_v0 = vshll.u32 %v388_v56, 16 }
 0x11d   : > { %v368_v42 = vpop.xlane.xlu2 %367  ;;  %v396_v46 = vpop.xlane.xlu1 %395 }
 0x11e   : > { %vm369_vm7 = vcmp.eq.f32.partialorder %v366_v33, %v368_v42  ;;  %vm397_vm8 = vcmp.eq.f32.partialorder %v394_v32, %v396_v46  ;;  %v374_v53 = vcvt.f32.s32 %v368_v42  ;;  %v402_v57 = vcvt.f32.s32 %v396_v46 }
 0x11f   : > { %v370_v45 = vsel %vm369_vm7, %v365_v44, -inf  ;;  %v398_v49 = vsel %vm397_vm8, %v393_v48, -inf }
 0x120   : > { %385 = vmax.xlane.f32.xlu2 %v384_v41  ;;  %v375_v58 = vshll.u32 %v374_v53, 16  ;;  %v403_v1 = vshll.u32 %v402_v57, 16 }
 0x128   : > { %371 = vmax.xlane.f32.xlu2 %v370_v45 }
 0x130   : > { %399 = vmax.xlane.f32.xlu2 %v398_v49 }
 0x18b   : > { %v358_v50 = vpop.xlane.xlu2 %357 }
 0x18c   : > { %v359_v59 = vcvt.f32.s32 %v358_v50 }
 0x18e   : > { %v362_v2 = vadd.s32 %v361_v60, %v359_v59 }
 0x193   : > { %v386_v51 = vpop.xlane.xlu2 %385 }
 0x194   : > { %v387_v61 = vcvt.f32.s32 %v386_v51 }
 0x196   : > { %v390_v4 = vadd.s32 %v389_v0, %v387_v61 }
 0x19b   : > { %v372_v52 = vpop.xlane.xlu2 %371 }
 0x19c   : > { %v373_v55 = vcvt.f32.s32 %v372_v52 }
 0x19e   : > { %v376_v62 = vadd.s32 %v375_v58, %v373_v55 }
 0x1a0   : > { %vm405_vm9 = vcmp.gt.s32.totalorder %v362_v2, %v376_v62 }
 0x1a1   : > { %v406_v6 = vsel %vm405_vm9, %v362_v2, %v376_v62 }
 0x1a3   : > { %v400_v63 = vpop.xlane.xlu2 %399 }
 0x1a4   : > { %v401_v3 = vcvt.f32.s32 %v400_v63 }
 0x1a6   : > { %v404_v5 = vadd.s32 %v403_v1, %v401_v3 }
 0x1a8   : > { %vm407_vm10 = vcmp.gt.s32.totalorder %v390_v4, %v404_v5 }
 0x1a9   : > { %v408_v7 = vsel %vm407_vm10, %v390_v4, %v404_v5 }
 0x1aa   : > { %vm409_vm11 = vcmp.gt.s32.totalorder %v406_v6, %v408_v7 }
 0x1ab   : > { %v410_v8 = vsel %vm409_vm11, %v406_v6, %v408_v7 }
 0x1ac   : > { %v411_v9 = vrot.slane %v410_v8, 4 }
 0x1ae   : > { %vm412_vm12 = vcmp.gt.s32.totalorder %v410_v8, %v411_v9 }
 0x1af   : > { %v413_v10 = vsel %vm412_vm12, %v410_v8, %v411_v9 }
 0x1b0   : > { %v414_v11 = vrot.slane %v413_v10, 2 }
 0x1b2   : > { %vm415_vm13 = vcmp.gt.s32.totalorder %v413_v10, %v414_v11 }
 0x1b3   : > { %v416_v12 = vsel %vm415_vm13, %v413_v10, %v414_v11 }
 0x1b4   : > { %v417_v13 = vrot.slane %v416_v12, 1 }
 0x1b6   : > { %vm418_vm14 = vcmp.gt.s32.totalorder %v416_v12, %v417_v13 }
 0x1b7   : > { %v419_v14 = vsel %vm418_vm14, %v416_v12, %v417_v13 }
 0x1b8   : > { %420 = vst [vmem:[%s247_s20] sm:$0xff] %v419_v14 }
 0x1b9 PF: > { %s15_s17 = sadd.s32 1, %s637_s17   ;;  %s729_s15 = smov %s633_s16 }
 0x1ba   : > { %p12_p5 = scmp.ge.s32.totalorder %s15_s17, 4   ;;  %s730_s16 = smov %s732_s18 }
 0x1bc   :  { %14 = sbr.rel (!%p12_p5) target bundleno = 2 (0x2), region = 74 }

</bundles_post_ra>
